<compile_context>
chip_gen: v7x
topology: tpu7x:2x2x1
jax: 0.10.0
libtpu: 0.0.40
codegen_flags: <defaults>
</compile_context>

<pallas_src>
import functools

import jax
import jax.numpy as jnp
from jax.experimental import pallas as pl
from jax.experimental.pallas import tpu as pltpu

LANE = 128       # vreg lane width
SUBLANE = 8      # vreg sublane quantum (f32)
HIDDEN = 64      # hidden width of the first Linear


def _round_up(v, m):
    return ((v + m - 1) // m) * m


def decoder_kernel(x_ref, w1_ref, b1_ref, w2_ref, b2_ref, w3_ref, b3_ref,
                   recon_ref, out_ref):
    # layer 1: Linear(in_dim, 64) + Tanh  (bf16 MXU inputs, f32 accumulate, f32 VPU/EUP)
    h1 = jnp.tanh(
        jnp.dot(x_ref[...], w1_ref[...], preferred_element_type=jnp.float32)
        + b1_ref[...]
    )
    # layer 2: Linear(64, out_dim1_padded) -> recon_gcn (stored f32, 128-lane dense)
    recon = (
        jnp.dot(h1.astype(jnp.bfloat16), w2_ref[...],
                preferred_element_type=jnp.float32)
        + b2_ref[...]
    )
    recon_ref[...] = recon
    # fc3: Linear(out_dim1_padded, out_dim2_padded) on tanh(recon_gcn)
    h2 = jnp.tanh(recon).astype(jnp.bfloat16)
    out_ref[...] = (
        jnp.dot(h2, w3_ref[...], preferred_element_type=jnp.float32)
        + b3_ref[...]
    )


@functools.partial(jax.jit, static_argnames=("tn",))
def decoder_forward(x, params, *, tn=512):
    """x: [N, in_dim] f32. params: w1,b1,w2,b2,w3,b3 with weights [in,out], biases [1,out].

    Returns (recon_gcn [N, out_dim1], output [N, out_dim2]), both f32.
    """
    n, in_dim = x.shape
    out_dim1 = params["w2"].shape[1]
    out_dim2 = params["w3"].shape[1]
    p1 = _round_up(out_dim1, LANE)       # lane-dense (128-padded) output widths
    p2 = _round_up(out_dim2, LANE)

    # Batch tile: multiple of the 8-row sublane quantum; pad N so the grid divides evenly.
    tn = _round_up(min(tn, _round_up(n, SUBLANE)), SUBLANE)
    n_pad = _round_up(n, tn)

    # bf16 activations/weights halve HBM+VMEM traffic; math/accumulation stays f32 in-kernel.
    x_b = x.astype(jnp.bfloat16)
    if n_pad != n:
        x_b = jnp.pad(x_b, ((0, n_pad - n), (0, 0)))
    w1 = params["w1"].astype(jnp.bfloat16)
    b1 = params["b1"].astype(jnp.float32)
    # Zero-pad output dims to 128 lanes; zero pad rows of w3 so padded recon columns
    # (which are exactly 0 -> tanh(0)=0) contribute nothing to the real output columns.
    w2 = jnp.pad(params["w2"], ((0, 0), (0, p1 - out_dim1))).astype(jnp.bfloat16)
    b2 = jnp.pad(params["b2"], ((0, 0), (0, p1 - out_dim1))).astype(jnp.float32)
    w3 = jnp.pad(params["w3"],
                 ((0, p1 - out_dim1), (0, p2 - out_dim2))).astype(jnp.bfloat16)
    b3 = jnp.pad(params["b3"], ((0, 0), (0, p2 - out_dim2))).astype(jnp.float32)

    grid = (n_pad // tn,)
    const = lambda i: (0, 0)   # weights/biases: resident in VMEM across all grid steps
    row = lambda i: (i, 0)     # batch-tiled operands: pipelined HBM<->VMEM

    cost = pl.CostEstimate(
        flops=2 * n_pad * (in_dim * HIDDEN + HIDDEN * p1 + p1 * p2),
        transcendentals=n_pad * (HIDDEN + p1),
        bytes_accessed=(x_b.size * 2                       # bf16 x
                        + n_pad * (p1 + p2) * 4            # f32 recon + out
                        + (w1.size + w2.size + w3.size) * 2
                        + (b1.size + b2.size + b3.size) * 4),
    )

    recon_p, out_p = pl.pallas_call(
        decoder_kernel,
        out_shape=(
            jax.ShapeDtypeStruct((n_pad, p1), jnp.float32),
            jax.ShapeDtypeStruct((n_pad, p2), jnp.float32),
        ),
        grid=grid,
        in_specs=[
            pl.BlockSpec((tn, in_dim), row),       # x tile
            pl.BlockSpec((in_dim, HIDDEN), const),  # w1
            pl.BlockSpec((1, HIDDEN), const),       # b1
            pl.BlockSpec((HIDDEN, p1), const),      # w2 (lane-padded)
            pl.BlockSpec((1, p1), const),           # b2
            pl.BlockSpec((p1, p2), const),          # w3 (row+lane padded)
            pl.BlockSpec((1, p2), const),           # b3
        ],
        out_specs=(
            pl.BlockSpec((tn, p1), row),            # recon_gcn tile
            pl.BlockSpec((tn, p2), row),            # output tile
        ),
        compiler_params=pltpu.CompilerParams(
            dimension_semantics=("parallel",),      # shard batch loop across TCs (v7x)
        ),
        cost_estimate=cost,
    )(x_b, w1, b1, w2, b2, w3, b3)

    # Strip batch padding and lane padding.
    return recon_p[:n, :out_dim1], out_p[:n, :out_dim2]


def init_params(key, in_dim, out_dim1, out_dim2):
    """Deterministic synthetic init (uniform, like PyTorch's default Linear init scale)."""
    ks = jax.random.split(key, 6)

    def lin(kw, kb, fan_in, fan_out):
        bound = 1.0 / jnp.sqrt(fan_in)
        w = jax.random.uniform(kw, (fan_in, fan_out), jnp.float32, -bound, bound)
        b = jax.random.uniform(kb, (1, fan_out), jnp.float32, -bound, bound)
        return w, b

    w1, b1 = lin(ks[0], ks[1], in_dim, HIDDEN)
    w2, b2 = lin(ks[2], ks[3], HIDDEN, out_dim1)
    w3, b3 = lin(ks[4], ks[5], out_dim1, out_dim2)
    return {"w1": w1, "b1": b1, "w2": w2, "b2": b2, "w3": w3, "b3": b3}


def reference_forward_f32(x, p):
    h1 = jnp.tanh(x @ p["w1"] + p["b1"])
    recon = h1 @ p["w2"] + p["b2"]
    out = jnp.tanh(recon) @ p["w3"] + p["b3"]
    return recon, out


def reference_forward_bf16(x, p):
    """Emulates the kernel's precision (bf16 matmul inputs, f32 accumulate/tanh)."""
    bf = lambda a: a.astype(jnp.bfloat16)
    h1 = jnp.tanh(jnp.dot(bf(x), bf(p["w1"]), preferred_element_type=jnp.float32)
                  + p["b1"])
    recon = jnp.dot(bf(h1), bf(p["w2"]), preferred_element_type=jnp.float32) + p["b2"]
    out = jnp.dot(bf(jnp.tanh(recon)), bf(p["w3"]),
                  preferred_element_type=jnp.float32) + p["b3"]
    return recon, out


if __name__ == "__main__":
    key = jax.random.PRNGKey(0)
    k_x, k_p, k_x2 = jax.random.split(key, 3)

    batch, in_dim, out_dim1, out_dim2 = 8, 32, 16, 8
    x = jax.random.normal(k_x, (batch, in_dim), dtype=jnp.float32)
    params = init_params(k_p, in_dim, out_dim1, out_dim2)

    recon, out = decoder_forward(x, params)
    jax.block_until_ready((recon, out))
    assert recon.shape == (batch, out_dim1)
    assert out.shape == (batch, out_dim2)

    # exact-precision (bf16-emulated) reference and loose f32 reference checks
    r_bf, o_bf = reference_forward_bf16(x, params)
    r_f, o_f = reference_forward_f32(x, params)
    assert jnp.allclose(recon, r_bf, atol=1e-3, rtol=1e-3)
    assert jnp.allclose(out, o_bf, atol=1e-3, rtol=1e-3)
    assert jnp.allclose(recon, r_f, atol=5e-2, rtol=5e-2)
    assert jnp.allclose(out, o_f, atol=5e-2, rtol=5e-2)

    # second case: batch not a multiple of the tile -> exercises multi-step grid + tail padding
    batch2 = 300
    x2 = jax.random.normal(k_x2, (batch2, in_dim), dtype=jnp.float32)
    recon2, out2 = decoder_forward(x2, params, tn=128)
    jax.block_until_ready((recon2, out2))
    r2, o2 = reference_forward_bf16(x2, params)
    assert recon2.shape == (batch2, out_dim1)
    assert out2.shape == (batch2, out_dim2)
    assert jnp.allclose(recon2, r2, atol=1e-3, rtol=1e-3)
    assert jnp.allclose(out2, o2, atol=1e-3, rtol=1e-3)

    print("KERNEL_OK")
</pallas_src>

<mosaic_0001>
module attributes {stable_mosaic.version = 11 : i64} {
  func.func @decoder_kernel(%arg0: i32, %arg1: memref<8x32xbf16, #tpu.memory_space<vmem>>, %arg2: memref<32x64xbf16, #tpu.memory_space<vmem>>, %arg3: memref<1x64xf32, #tpu.memory_space<vmem>>, %arg4: memref<64x128xbf16, #tpu.memory_space<vmem>>, %arg5: memref<1x128xf32, #tpu.memory_space<vmem>>, %arg6: memref<128x128xbf16, #tpu.memory_space<vmem>>, %arg7: memref<1x128xf32, #tpu.memory_space<vmem>>, %arg8: memref<8x128xf32, #tpu.memory_space<vmem>>, %arg9: memref<8x128xf32, #tpu.memory_space<vmem>>) attributes {dimension_semantics = [#tpu.dimension_semantics<parallel>], iteration_bounds = array<i64: 1>, scalar_prefetch = 0 : i64, scratch_operands = 0 : i64, tpu.core_type = #tpu.core_type<tc>, window_params = [{transform_indices = @transform_0, window_bounds = array<i64: 8, 32>}, {pipeline_mode = #tpu.pipeline_mode<synchronous>, transform_indices = @transform_1, window_bounds = array<i64: 32, 64>}, {pipeline_mode = #tpu.pipeline_mode<synchronous>, transform_indices = @transform_2, window_bounds = array<i64: 1, 64>}, {pipeline_mode = #tpu.pipeline_mode<synchronous>, transform_indices = @transform_3, window_bounds = array<i64: 64, 128>}, {pipeline_mode = #tpu.pipeline_mode<synchronous>, transform_indices = @transform_4, window_bounds = array<i64: 1, 128>}, {pipeline_mode = #tpu.pipeline_mode<synchronous>, transform_indices = @transform_5, window_bounds = array<i64: 128, 128>}, {pipeline_mode = #tpu.pipeline_mode<synchronous>, transform_indices = @transform_6, window_bounds = array<i64: 1, 128>}, {transform_indices = @transform_7, window_bounds = array<i64: 8, 128>}, {transform_indices = @transform_8, window_bounds = array<i64: 8, 128>}]} {
    %c0 = arith.constant 0 : index
    %c0_0 = arith.constant 0 : index
    %0 = vector.load %arg1[%c0, %c0_0] : memref<8x32xbf16, #tpu.memory_space<vmem>>, vector<8x32xbf16>
    %c0_1 = arith.constant 0 : index
    %c0_2 = arith.constant 0 : index
    %1 = vector.load %arg2[%c0_1, %c0_2] : memref<32x64xbf16, #tpu.memory_space<vmem>>, vector<32x64xbf16>
    %cst = arith.constant dense<0.000000e+00> : vector<8x64xf32>
    %2 = tpu.matmul %0, %1, %cst {dimension_numbers = #tpu.dot_dimension_numbers<[1], [0], [0], [1], [0, 0, 1, 1], [], []>} : vector<8x32xbf16>, vector<32x64xbf16>, vector<8x64xf32> -> vector<8x64xf32>
    %c0_3 = arith.constant 0 : index
    %c0_4 = arith.constant 0 : index
    %3 = vector.load %arg3[%c0_3, %c0_4] : memref<1x64xf32, #tpu.memory_space<vmem>>, vector<1x64xf32>
    %4 = vector.broadcast %3 : vector<1x64xf32> to vector<8x64xf32>
    %5 = arith.addf %2, %4 : vector<8x64xf32>
    %6 = math.tanh %5 : vector<8x64xf32>
    %7 = arith.truncf %6 : vector<8x64xf32> to vector<8x64xbf16>
    %c0_5 = arith.constant 0 : index
    %c0_6 = arith.constant 0 : index
    %8 = vector.load %arg4[%c0_5, %c0_6] : memref<64x128xbf16, #tpu.memory_space<vmem>>, vector<64x128xbf16>
    %cst_7 = arith.constant dense<0.000000e+00> : vector<8x128xf32>
    %9 = tpu.matmul %7, %8, %cst_7 {dimension_numbers = #tpu.dot_dimension_numbers<[1], [0], [0], [1], [0, 0, 1, 1], [], []>} : vector<8x64xbf16>, vector<64x128xbf16>, vector<8x128xf32> -> vector<8x128xf32>
    %c0_8 = arith.constant 0 : index
    %c0_9 = arith.constant 0 : index
    %10 = vector.load %arg5[%c0_8, %c0_9] : memref<1x128xf32, #tpu.memory_space<vmem>>, vector<1x128xf32>
    %11 = vector.broadcast %10 : vector<1x128xf32> to vector<8x128xf32>
    %12 = arith.addf %9, %11 : vector<8x128xf32>
    %c0_10 = arith.constant 0 : index
    %c0_11 = arith.constant 0 : index
    %13 = vector.load %arg8[%c0_10, %c0_11] : memref<8x128xf32, #tpu.memory_space<vmem>>, vector<8x128xf32>
    tpu.vector_store %arg8[%c0_10, %c0_11], %12 {strides = array<i32>} : memref<8x128xf32, #tpu.memory_space<vmem>>, vector<8x128xf32>,
    %14 = math.tanh %12 : vector<8x128xf32>
    %15 = arith.truncf %14 : vector<8x128xf32> to vector<8x128xbf16>
    %c0_12 = arith.constant 0 : index
    %c0_13 = arith.constant 0 : index
    %16 = vector.load %arg6[%c0_12, %c0_13] : memref<128x128xbf16, #tpu.memory_space<vmem>>, vector<128x128xbf16>
    %cst_14 = arith.constant dense<0.000000e+00> : vector<8x128xf32>
    %17 = tpu.matmul %15, %16, %cst_14 {dimension_numbers = #tpu.dot_dimension_numbers<[1], [0], [0], [1], [0, 0, 1, 1], [], []>} : vector<8x128xbf16>, vector<128x128xbf16>, vector<8x128xf32> -> vector<8x128xf32>
    %c0_15 = arith.constant 0 : index
    %c0_16 = arith.constant 0 : index
    %18 = vector.load %arg7[%c0_15, %c0_16] : memref<1x128xf32, #tpu.memory_space<vmem>>, vector<1x128xf32>
    %19 = vector.broadcast %18 : vector<1x128xf32> to vector<8x128xf32>
    %20 = arith.addf %17, %19 : vector<8x128xf32>
    %c0_17 = arith.constant 0 : index
    %c0_18 = arith.constant 0 : index
    %21 = vector.load %arg9[%c0_17, %c0_18] : memref<8x128xf32, #tpu.memory_space<vmem>>, vector<8x128xf32>
    tpu.vector_store %arg9[%c0_17, %c0_18], %20 {strides = array<i32>} : memref<8x128xf32, #tpu.memory_space<vmem>>, vector<8x128xf32>,
    return
  }
  func.func @transform_0(%arg0: i32) -> (i32, i32) {
    %c0_i32 = arith.constant 0 : i32
    %c0_i32_0 = arith.constant 0 : i32
    return %arg0, %c0_i32 : i32, i32
  }
  func.func @transform_1(%arg0: i32) -> (i32, i32) {
    %c0_i32 = arith.constant 0 : i32
    %c0_i32_0 = arith.constant 0 : i32
    %c0_i32_1 = arith.constant 0 : i32
    return %c0_i32, %c0_i32_0 : i32, i32
  }
  func.func @transform_2(%arg0: i32) -> (i32, i32) {
    %c0_i32 = arith.constant 0 : i32
    %c0_i32_0 = arith.constant 0 : i32
    %c0_i32_1 = arith.constant 0 : i32
    return %c0_i32, %c0_i32_0 : i32, i32
  }
  func.func @transform_3(%arg0: i32) -> (i32, i32) {
    %c0_i32 = arith.constant 0 : i32
    %c0_i32_0 = arith.constant 0 : i32
    %c0_i32_1 = arith.constant 0 : i32
    return %c0_i32, %c0_i32_0 : i32, i32
  }
  func.func @transform_4(%arg0: i32) -> (i32, i32) {
    %c0_i32 = arith.constant 0 : i32
    %c0_i32_0 = arith.constant 0 : i32
    %c0_i32_1 = arith.constant 0 : i32
    return %c0_i32, %c0_i32_0 : i32, i32
  }
  func.func @transform_5(%arg0: i32) -> (i32, i32) {
    %c0_i32 = arith.constant 0 : i32
    %c0_i32_0 = arith.constant 0 : i32
    %c0_i32_1 = arith.constant 0 : i32
    return %c0_i32, %c0_i32_0 : i32, i32
  }
  func.func @transform_6(%arg0: i32) -> (i32, i32) {
    %c0_i32 = arith.constant 0 : i32
    %c0_i32_0 = arith.constant 0 : i32
    %c0_i32_1 = arith.constant 0 : i32
    return %c0_i32, %c0_i32_0 : i32, i32
  }
  func.func @transform_7(%arg0: i32) -> (i32, i32) {
    %c0_i32 = arith.constant 0 : i32
    %c0_i32_0 = arith.constant 0 : i32
    return %arg0, %c0_i32 : i32, i32
  }
  func.func @transform_8(%arg0: i32) -> (i32, i32) {
    %c0_i32 = arith.constant 0 : i32
    %c0_i32_0 = arith.constant 0 : i32
    return %arg0, %c0_i32 : i32, i32
  }
}

</mosaic_0001>

<bundles_post_ra>
// kernel: decoder_forward.1
= control target key start
LH: loop header
LB: loop body
LE: loop exit
PB: predicated region body
PF: predicated region fallthrough
CT: control target
= control target key end

     0   :  { %14 = vsyncpa [#allocation3], 0  ;;  %v473_v1 = vmov 0.0   ;;  %vm474_vm0 = vmmov 0   ;;  %vm55_vm1 = vcmask 261120   ;;  %s600_s0 = inlined_call_operand.vmem [shape: bf16[8,32], index: 0, kind: input, shape index: {}]   ;;  %s601_s1 = inlined_call_operand.vmem [shape: bf16[32,64], index: 1, kind: input, shape index: {}]   ;;  %s602_s2 = inlined_call_operand.vmem [shape: f32[1,64], index: 2, kind: input, shape index: {}]   ;;  %s603_s3 = inlined_call_operand.vmem [shape: bf16[64,128], index: 3, kind: input, shape index: {}]   ;;  %s604_s4 = inlined_call_operand.vmem [shape: f32[1,128], index: 4, kind: input, shape index: {}]   ;;  %s605_s5 = inlined_call_operand.vmem [shape: bf16[128,128], index: 5, kind: input, shape index: {}]   ;;  %s606_s6 = inlined_call_operand.vmem [shape: f32[1,128], index: 6, kind: input, shape index: {}]   ;;  %s607_s7 = inlined_call_operand.hbm [shape: f32[8,128], index: 7, kind: output, shape index: {0}]   ;;  %s608_s8 = inlined_call_operand.hbm [shape: f32[8,128], index: 8, kind: output, shape index: {1}]  }
   0x1   :  { %v407_v0 = vld [vmem:[%s601_s1] sm:$0xff]   ;;  %363 = vmatprep.subr.bf16.mxu1 %v473_v1  ;;  %383 = vmatprep.subr.bf16.mxu0 %v473_v1  ;;  %v408_v2 = vld [vmem:[%s601_s1 + $0x8] sm:$0xff]  }
   0x2   :  { %364 = vmatpush3.bf16.msra.mxu1 %v407_v0  ;;  %367 = vmatprep.mubr.msk.bf16.mxu1 %vm474_vm0, %v473_v1  ;;  %v31_v3 = vld [vmem:[%s600_s0] sm:$0xf] }
   0x3   :  { %365 = vmatprep.subr.bf16.mxu1 %v473_v1  ;;  %399 = vmatprep.mubr.msk.bf16.mxu0 %vm474_vm0, %v473_v1 }
   0x6   :  { %366 = vmatpush3.bf16.msra.mxu1 %v408_v2 }
   0x7   :  { %371 = vmatprep.subr.bf16.mxu1 %v473_v1 }
   0x9   :  { %368 = vmatmul.mubr.msk.bf16.vlgmr.msra.gmra.mrb[0].mxu1 %vm55_vm1, %v31_v3 }
   0xa   :  { %379 = vmatprep.mubr.msk.bf16.mxu1 %vm474_vm0, %v473_v1 }
   0xb   :  { %15 = vsyncpa [#allocation5], 0  ;;  %v409_v4 = vld [vmem:[%s603_s3] sm:$0xff]   ;;  %v410_v5 = vld [vmem:[%s603_s3 + $0x8] sm:$0xff]   ;;  %vm140_vm2 = vcmask 523264   ;;  %s475_s1 = smov [#allocation2]  }
   0xc   :  { %372 = vmatpush3.bf16.msra.mxu1 %v409_v4  ;;  %v411_v6 = vld [vmem:[%s603_s3 + $0x10] sm:$0xff]   ;;  %v412_v7 = vld [vmem:[%s603_s3 + $0x18] sm:$0xff]   ;;  %v413_v8 = vld [vmem:[%s605_s5] sm:$0xff]   ;;  %s305_s13 = sshll.u32 %s475_s1, 4  ;;  %s306_s13 = int_to_ptr.vmem [resolvable:$true] %s305_s13 }
   0xd   :  { %373 = vmatprep.subr.bf16.mxu1 %v473_v1  ;;  %384 = vmatpush3.bf16.msra.mxu0 %v413_v8  ;;  %v414_v9 = vld [vmem:[%s605_s5 + $0x8] sm:$0xff]   ;;  %v415_v10 = vld [vmem:[%s605_s5 + $0x10] sm:$0xff]   ;;  %v416_v11 = vld [vmem:[%s605_s5 + $0x18] sm:$0xff]   ;;  %p430_p1 = scmp.lt.s32.totalorder %s306_s13, %s306_s13 }
   0xe   :  { %385 = vmatprep.subr.bf16.mxu0 %v473_v1  ;;  %v327_v12 = vld [vmem:[%s602_s2] ss:$0 sm:$0xff]  ;;  %v418_v21 = vld [vmem:[%s605_s5 + $0x28] sm:$0xff]   ;;  %v419_v22 = vld [vmem:[%s605_s5 + $0x30] sm:$0xff]  }
   0xf   :  { %v417_v20 = vld [vmem:[%s605_s5 + $0x20] sm:$0xff]   ;;  %v420_v23 = vld [vmem:[%s605_s5 + $0x38] sm:$0xff]   ;;  %s425_s5 = scalar_lea.vmem %s306_s13, 128 }
  0x10   :  { %374 = vmatpush3.bf16.msra.mxu1 %v410_v5  ;;  %v331_v24 = vld [vmem:[%s604_s4] ss:$0 sm:$0xff]  ;;  %p426_p0 = scmp.ne.s32.totalorder %s306_s13, %s425_s5  ;;  %p431_p2 = scmp.lt.s32.totalorder %s425_s5, %s425_s5 }
  0x11   :  { %375 = vmatprep.subr.bf16.mxu1 %v473_v1  ;;  %386 = vmatpush3.bf16.msra.mxu0 %v414_v9 }
  0x12   :  { %387 = vmatprep.subr.bf16.mxu0 %v473_v1  ;;  %p432_p3 = por %p431_p2, %p430_p1 }
  0x14   :  { %376 = vmatpush3.bf16.msra.mxu1 %v411_v6  ;;  %p433_p4 = pnand %p432_p3, %p426_p0 }
  0x15   :  { %377 = vmatprep.subr.bf16.mxu1 %v473_v1  ;;  %388 = vmatpush3.bf16.msra.mxu0 %v415_v10 }
  0x16   :  { %389 = vmatprep.subr.bf16.mxu0 %v473_v1 }
  0x18   :  { %378 = vmatpush3.bf16.msra.mxu1 %v412_v7 }
  0x19   :  { %390 = vmatpush3.bf16.msra.mxu0 %v416_v11 }
  0x1a   :  { %391 = vmatprep.subr.bf16.mxu0 %v473_v1 }
  0x1d   :  { %392 = vmatpush3.bf16.msra.mxu0 %v417_v20 }
  0x1e   :  { %393 = vmatprep.subr.bf16.mxu0 %v473_v1 }
  0x21   :  { %394 = vmatpush3.bf16.msra.mxu0 %v418_v21 }
  0x22   :  { %395 = vmatprep.subr.bf16.mxu0 %v473_v1 }
  0x25   :  { %396 = vmatpush3.bf16.msra.mxu0 %v419_v22 }
  0x26   :  { %397 = vmatprep.subr.bf16.mxu0 %v473_v1 }
  0x29   :  { %398 = vmatpush3.bf16.msra.mxu0 %v420_v23 }
  0xdc   :  { %v93_v13 = vpop.f32.mrb[0].mxu1 }
  0xdd   :  { %v94_v14 = vadd.f32 %v327_v12, %v93_v13  ;;  %v369_v15 = vpop.f32.mrb[1].mxu1 }
  0xde   :  { %v96_v16 = vpop.f32.mrb[2].mxu1 }
  0xdf   :  { %421 = vtanh.f32 %v94_v14  ;;  %v370_v17 = vpop.f32.mrb[3].mxu1 }
  0xe9   :  { %v422_v18 = vpop.eup %421 }
  0xea   :  { %v100_v19 = vpack.c.bf16 %v422_v18, %v422_v18 }
  0xec   :  { %380 = vmatmul.mubr.msk.bf16.vlgmr.msra.gmra.mrb[4].mxu1 %vm140_vm2, %v100_v19 }
 0x1bf   :  { %v178_v25 = vpop.f32.mrb[4].mxu1 }
 0x1c0   :  { %v179_v26 = vadd.f32 %v331_v24, %v178_v25  ;;  %v381_v27 = vpop.f32.mrb[5].mxu1 }
 0x1c1   :  { %v181_v28 = vpop.f32.mrb[6].mxu1 }
 0x1c2   :  { %423 = vtanh.f32 %v179_v26  ;;  %184 = vst [vmem:[#allocation2] sm:$0xff] %v179_v26  ;;  %v382_v29 = vpop.f32.mrb[7].mxu1 }
 0x1cc   :  { %v424_v30 = vpop.eup %423 }
 0x1cd   :  { %v186_v31 = vpack.c.bf16 %v424_v30, %v424_v30 }
 0x1cf   :  { %400 = vmatmul.mubr.bf16.vlgmr.msra.gmra.mrb[0].mxu0 %v186_v31 }
 0x1d0   :  { %436 = shalt.err (!%p433_p4)
}
 0x1d1   :  { %s437_s15 = scalar_lea.hbm %s607_s7, 128 }
 0x1d2   :  { %p438_p5 = scmp.ne.s32.totalorder %s607_s7, %s437_s15  ;;  %p441_p6 = scmp.lt.u32.totalorder %s437_s15, %s607_s7 }
 0x1d4   :  { %p443_p7 = pnand %p441_p6, %p438_p5 }
 0x1d6   :  { %446 = shalt.err (!%p443_p7)
}
 0x1d7   :  { %308 = dma.vmem_to_hbm [thread:$0]  %s306_s13, 128, %s607_s7, [#allocation3]   ;;  %v337_v32 = vld [vmem:[%s606_s6] ss:$0 sm:$0xff] }
 0x1d8   :  { %s476_s23 = smov [#allocation4]  }
 0x1d9   :  { %s315_s3 = sshll.u32 %s476_s23, 4  ;;  %s316_s3 = int_to_ptr.vmem [resolvable:$true] %s315_s3 }
 0x1da   :  { %s447_s24 = scalar_lea.vmem %s316_s3, 128  ;;  %p452_p9 = scmp.lt.s32.totalorder %s316_s3, %s316_s3 }
 0x1db   :  { %p448_p8 = scmp.ne.s32.totalorder %s316_s3, %s447_s24  ;;  %p453_p10 = scmp.lt.s32.totalorder %s447_s24, %s447_s24 }
 0x1dd   :  { %p454_p11 = por %p453_p10, %p452_p9 }
 0x1df   :  { %p455_p12 = pnand %p454_p11, %p448_p8 }
 0x2a2   :  { %v292_v33 = vpop.f32.mrb[0].mxu0 }
 0x2a3   :  { %v293_v34 = vadd.f32 %v337_v32, %v292_v33  ;;  %v401_v35 = vpop.f32.mrb[1].mxu0 }
 0x2a4   :  { %v295_v36 = vpop.f32.mrb[2].mxu0 }
 0x2a5   :  { %298 = vst [vmem:[#allocation4] sm:$0xff] %v293_v34  ;;  %v402_v37 = vpop.f32.mrb[3].mxu0 }
 0x2a6   :  { %458 = shalt.err (!%p455_p12)
}
 0x2a7   :  { %s459_s6 = scalar_lea.hbm %s608_s8, 128 }
 0x2a8   :  { %p460_p13 = scmp.ne.s32.totalorder %s608_s8, %s459_s6  ;;  %p463_p0 = scmp.lt.u32.totalorder %s459_s6, %s608_s8 }
 0x2aa   :  { %p465_p1 = pnand %p463_p0, %p460_p13 }
 0x2ac   :  { %468 = shalt.err (!%p465_p1)
}
 0x2ad   :  { %318 = dma.vmem_to_hbm [thread:$0]  %s316_s3, 128, %s608_s8, [#allocation5]  }
 0x2ae   :  { %469 = dma.done.wait [#allocation3], 128  }
 0x2af   :  { %470 = vsyncadd [#allocation3], 4294967168 }
 0x2b0   :  { %471 = dma.done.wait [#allocation5], 128  }
 0x2b1   :  { %472 = vsyncadd [#allocation5], 4294967168 }
 0x2b2   :  { %325 = vsyncpa [#allocation3], 1 }
 0x2b3   :  { %326 = vsyncpa [#allocation5], 1 }

</bundles_post_ra>
